<compile_context>
chip_gen: v7x
topology: tpu7x:2x2x1
jax: 0.10.0
libtpu: 0.0.40
codegen_flags: <defaults>
</compile_context>

<pallas_src>
import functools

import jax
import jax.numpy as jnp
from jax.experimental import pallas as pl
from jax.experimental.pallas import tpu as pltpu


def _round_up(n, m):
    return ((n + m - 1) // m) * m


def _vmem_capacity_bytes():
    try:
        return int(pltpu.get_tpu_info().vmem_capacity_bytes)
    except Exception:
        return 64 * 1024 * 1024  # conservative fallback (v7x per-TC VMEM)


def classblock_kernel(x_ref, wconv_ref, bn_scale_ref, bn_bias_ref,
                      wlin_ref, blin_ref, out_ref):
    # x_ref:        (TM, Cin_p)   f32   (batch tile; cast to bf16 in-kernel)
    # wconv_ref:    (Cin_p, Nb_p) bf16  (1x1-conv weight, transposed)
    # bn_scale_ref: (1, Nb_p)     f32   (gamma / sqrt(var + eps))
    # bn_bias_ref:  (1, Nb_p)     f32   (beta - running_mean * scale)
    # wlin_ref:     (Nb_p, K_p)   bf16  (classifier weight, transposed)
    # blin_ref:     (1, K_p)      f32   (classifier bias)
    # out_ref:      (TM, K_p)     f32
    x = x_ref[...].astype(jnp.bfloat16)            # VPU cast (no wrapper HBM pass)
    # 1x1 Conv2d (bias=False) == one bf16 MXU matmul with f32 accumulation.
    y = jnp.dot(x, wconv_ref[...], preferred_element_type=jnp.float32)
    # BN (scale/bias in f32 on the accumulator) + ReLU on the VPU.
    y = jnp.maximum(y * bn_scale_ref[...] + bn_bias_ref[...], 0.0)
    # Linear classifier (MXU, bf16 operands, f32 acc) + bias.
    out_ref[...] = (
        jnp.dot(y.astype(wlin_ref.dtype), wlin_ref[...],
                preferred_element_type=jnp.float32)
        + blin_ref[...]
    )


def prepare_params(w_conv, bn_gamma, bn_beta, bn_mean, bn_var, w_lin, b_lin,
                   eps=1e-5):
    """One-time preprocessing: transpose, zero-pad to 128 multiples, cast.

    BN scale/bias are kept as separate f32 row vectors (applied on the f32
    accumulator in-kernel) rather than folded into the bf16 conv weight.
    """
    Nb, Cin = w_conv.shape[0], w_conv.shape[1]
    K = w_lin.shape[0]
    Cin_p = _round_up(Cin, 128)
    Nb_p = _round_up(Nb, 128)
    K_p = _round_up(K, 128)

    bn_scale = bn_gamma / jnp.sqrt(bn_var + eps)              # (Nb,)
    bn_bias = bn_beta - bn_mean * bn_scale                    # (Nb,)

    # Conv weight -> (Cin, Nb), zero-pad to (Cin_p, Nb_p).
    wconv_t = jnp.transpose(w_conv.reshape(Nb, Cin))
    wconv_p = jnp.pad(wconv_t, ((0, Cin_p - Cin), (0, Nb_p - Nb)))
    bn_scale_p = jnp.pad(bn_scale, (0, Nb_p - Nb)).reshape(1, Nb_p)
    bn_bias_p = jnp.pad(bn_bias, (0, Nb_p - Nb)).reshape(1, Nb_p)

    # Classifier weight -> (Nb, K), zero-pad columns so the output is
    # lane-dense (multiple of 128); padded columns are sliced off outside.
    # (Kept in bf16: second matmul error ~0.4% rel on N(0,1e-3) weights, within
    #  tolerance; switch to f32 here if accuracy regressions appear.)
    wlin_t = jnp.transpose(w_lin)
    wlin_p = jnp.pad(wlin_t, ((0, Nb_p - Nb), (0, K_p - K)))
    blin_p = jnp.pad(b_lin, (0, K_p - K)).reshape(1, K_p)

    return dict(
        wconv=wconv_p.astype(jnp.bfloat16),
        bn_scale=bn_scale_p.astype(jnp.float32),
        bn_bias=bn_bias_p.astype(jnp.float32),
        wlin=wlin_p.astype(jnp.bfloat16),
        blin=blin_p.astype(jnp.float32),
    )


@functools.partial(jax.jit, static_argnames=("class_num",))
def classblock_forward(x_nchw, wconv, bn_scale, bn_bias, wlin, blin, *,
                       class_num):
    """x_nchw: (B, Cin, 1, 1) float32.  Returns (B, class_num) float32."""
    B, Cin, H, W = x_nchw.shape
    assert H == 1 and W == 1, "ClassBlock forward (squeeze -> Linear) requires H=W=1"
    Cin_p, Nb_p = wconv.shape
    K_p = wlin.shape[1]

    # --- VMEM accounting (all sizes known at trace time) ---------------------
    # Resident weights are single-buffered (pl.Buffered(1)); the (1, N) bias /
    # scale rows pad to 8 sublanes in VMEM.
    weight_bytes = (Cin_p * Nb_p * 2 + Nb_p * K_p * 2
                    + 2 * 8 * Nb_p * 4 + 8 * K_p * 4)

    def _tile_bytes(tm):
        # Double-buffered f32 x tile + f32 out tile.
        return 2 * (tm * Cin_p * 4 + tm * K_p * 4)

    vmem_cap = _vmem_capacity_bytes()          # 128 MiB v5e/v6e, 64 MiB v7x
    budget = int(vmem_cap * 0.75)

    # Batch tile: up to 1024 rows where VMEM allows (amortizes the ~0.35 us
    # per-step pipeline overhead on the mem-bound v6e/v7x), but capped at
    # ceil(B/2) so there are >= 2 grid steps whenever possible, letting the
    # "parallel" batch axis shard across v7x's 2 TensorCores.
    TM = min(1024, _round_up(B, 16))
    TM = min(TM, max(16, _round_up(pl.cdiv(B, 2), 16)))
    while TM > 16 and weight_bytes + _tile_bytes(TM) > budget:
        TM = _round_up(TM // 2, 16)
    B_p = _round_up(B, TM)

    # Explicit scoped-VMEM limit (default is only 16 MiB v5e / 32 MiB v6e,v7x).
    vmem_limit = int(min(vmem_cap,
                         max(16 << 20, weight_bytes + _tile_bytes(TM) + (4 << 20))))

    # Glue: flatten NCHW -> (B, Cin) in f32; only pad if actually needed
    # (at real PCB sizes Cin=2048 is already a multiple of 128).
    x2d = x_nchw.reshape(B, Cin)
    if B_p != B or Cin_p != Cin:
        x2d = jnp.pad(x2d, ((0, B_p - B), (0, Cin_p - Cin)))

    resident = pl.Buffered(buffer_count=1)     # constant index_map -> never re-DMA'd

    out = pl.pallas_call(
        classblock_kernel,
        out_shape=jax.ShapeDtypeStruct((B_p, K_p), jnp.float32),
        grid_spec=pltpu.PrefetchScalarGridSpec(
            num_scalar_prefetch=0,
            grid=(B_p // TM,),
            in_specs=[
                pl.BlockSpec((TM, Cin_p), lambda i: (i, 0)),         # x tile (f32)
                pl.BlockSpec((Cin_p, Nb_p), lambda i: (0, 0),
                             pipeline_mode=resident),                # conv W
                pl.BlockSpec((1, Nb_p), lambda i: (0, 0),
                             pipeline_mode=resident),                # bn scale
                pl.BlockSpec((1, Nb_p), lambda i: (0, 0),
                             pipeline_mode=resident),                # bn bias
                pl.BlockSpec((Nb_p, K_p), lambda i: (0, 0),
                             pipeline_mode=resident),                # linear W
                pl.BlockSpec((1, K_p), lambda i: (0, 0),
                             pipeline_mode=resident),                # linear bias
            ],
            out_specs=pl.BlockSpec((TM, K_p), lambda i: (i, 0)),
        ),
        compiler_params=pltpu.CompilerParams(
            dimension_semantics=("parallel",),
            vmem_limit_bytes=vmem_limit),
    )(x2d, wconv, bn_scale, bn_bias, wlin, blin)

    # Drop batch / class padding outside the kernel.
    return out[:B, :class_num]


def init_params(key, input_dim, class_num, num_bottleneck):
    """Deterministic init matching weights_init_kaiming / weights_init_classifier."""
    k_conv, k_bn, k_lin = jax.random.split(key, 3)

    # Conv2d: kaiming_normal_(mode='fan_out', nonlinearity='relu')
    # fan_out = out_channels * kH * kW = num_bottleneck; gain = sqrt(2)
    conv_std = (2.0 / num_bottleneck) ** 0.5
    w_conv = conv_std * jax.random.normal(
        k_conv, (num_bottleneck, input_dim, 1, 1), jnp.float32)

    # BatchNorm2d: weight = 1, bias = 0 (per weights_init_kaiming); fresh stats.
    bn_gamma = jnp.ones((num_bottleneck,), jnp.float32)
    bn_beta = jnp.zeros((num_bottleneck,), jnp.float32)
    bn_mean = jnp.zeros((num_bottleneck,), jnp.float32)
    bn_var = jnp.ones((num_bottleneck,), jnp.float32)

    # Linear classifier: weight ~ N(0, 0.001), bias = 0.
    w_lin = 0.001 * jax.random.normal(k_lin, (class_num, num_bottleneck), jnp.float32)
    b_lin = jnp.zeros((class_num,), jnp.float32)

    return w_conv, bn_gamma, bn_beta, bn_mean, bn_var, w_lin, b_lin


if __name__ == "__main__":
    B, input_dim, num_bottleneck, class_num = 2, 4, 32, 8

    key = jax.random.PRNGKey(0)
    k_x, k_p = jax.random.split(key)

    # PCB feeds pooled part features: (B, C, 1, 1).
    x = jax.random.normal(k_x, (B, input_dim, 1, 1), jnp.float32)
    raw_params = init_params(k_p, input_dim, class_num, num_bottleneck)

    prepared = prepare_params(*raw_params)        # one-time (not per forward)
    out = classblock_forward(x, prepared["wconv"], prepared["bn_scale"],
                             prepared["bn_bias"], prepared["wlin"],
                             prepared["blin"], class_num=class_num)
    jax.block_until_ready(out)

    # Pure-JAX f32 reference of the original module math.
    w_conv, bn_gamma, bn_beta, bn_mean, bn_var, w_lin, b_lin = raw_params
    x2d = x.reshape(B, input_dim)
    ref = x2d @ w_conv.reshape(num_bottleneck, input_dim).T
    ref = ref * (bn_gamma / jnp.sqrt(bn_var + 1e-5)) + bn_beta
    ref = jnp.maximum(ref, 0.0)
    ref = ref @ w_lin.T + b_lin

    assert out.shape == (B, class_num)
    # bf16 matmul operands, f32 accumulation -> loose-ish tolerance.
    assert jnp.allclose(out, ref, atol=5e-3, rtol=5e-2), (
        float(jnp.max(jnp.abs(out - ref))))

    print("KERNEL_OK")
</pallas_src>

<mosaic_0001>
module attributes {stable_mosaic.version = 11 : i64} {
  func.func @classblock_kernel(%arg0: i32, %arg1: memref<16x128xf32, #tpu.memory_space<vmem>>, %arg2: memref<128x128xbf16, #tpu.memory_space<vmem>>, %arg3: memref<1x128xf32, #tpu.memory_space<vmem>>, %arg4: memref<1x128xf32, #tpu.memory_space<vmem>>, %arg5: memref<128x128xbf16, #tpu.memory_space<vmem>>, %arg6: memref<1x128xf32, #tpu.memory_space<vmem>>, %arg7: memref<16x128xf32, #tpu.memory_space<vmem>>) attributes {dimension_semantics = [#tpu.dimension_semantics<parallel>], iteration_bounds = array<i64: 1>, scalar_prefetch = 0 : i64, scratch_operands = 0 : i64, tpu.core_type = #tpu.core_type<tc>, window_params = [{transform_indices = @transform_0, window_bounds = array<i64: 16, 128>}, {pipeline_mode = #tpu.pipeline_mode<synchronous>, transform_indices = @transform_1, window_bounds = array<i64: 128, 128>}, {pipeline_mode = #tpu.pipeline_mode<synchronous>, transform_indices = @transform_2, window_bounds = array<i64: 1, 128>}, {pipeline_mode = #tpu.pipeline_mode<synchronous>, transform_indices = @transform_3, window_bounds = array<i64: 1, 128>}, {pipeline_mode = #tpu.pipeline_mode<synchronous>, transform_indices = @transform_4, window_bounds = array<i64: 128, 128>}, {pipeline_mode = #tpu.pipeline_mode<synchronous>, transform_indices = @transform_5, window_bounds = array<i64: 1, 128>}, {transform_indices = @transform_6, window_bounds = array<i64: 16, 128>}]} {
    %c0 = arith.constant 0 : index
    %c0_0 = arith.constant 0 : index
    %0 = vector.load %arg1[%c0, %c0_0] : memref<16x128xf32, #tpu.memory_space<vmem>>, vector<16x128xf32>
    %1 = arith.truncf %0 : vector<16x128xf32> to vector<16x128xbf16>
    %c0_1 = arith.constant 0 : index
    %c0_2 = arith.constant 0 : index
    %2 = vector.load %arg2[%c0_1, %c0_2] : memref<128x128xbf16, #tpu.memory_space<vmem>>, vector<128x128xbf16>
    %cst = arith.constant dense<0.000000e+00> : vector<16x128xf32>
    %3 = tpu.matmul %1, %2, %cst {dimension_numbers = #tpu.dot_dimension_numbers<[1], [0], [0], [1], [0, 0, 1, 1], [], []>} : vector<16x128xbf16>, vector<128x128xbf16>, vector<16x128xf32> -> vector<16x128xf32>
    %c0_3 = arith.constant 0 : index
    %c0_4 = arith.constant 0 : index
    %4 = vector.load %arg3[%c0_3, %c0_4] : memref<1x128xf32, #tpu.memory_space<vmem>>, vector<1x128xf32>
    %5 = vector.broadcast %4 : vector<1x128xf32> to vector<16x128xf32>
    %6 = arith.mulf %3, %5 : vector<16x128xf32>
    %c0_5 = arith.constant 0 : index
    %c0_6 = arith.constant 0 : index
    %7 = vector.load %arg4[%c0_5, %c0_6] : memref<1x128xf32, #tpu.memory_space<vmem>>, vector<1x128xf32>
    %8 = vector.broadcast %7 : vector<1x128xf32> to vector<16x128xf32>
    %9 = arith.addf %6, %8 : vector<16x128xf32>
    %cst_7 = arith.constant 0.000000e+00 : f32
    %10 = vector.broadcast %cst_7 : f32 to vector<16x128xf32>
    %11 = arith.maximumf %9, %10 : vector<16x128xf32>
    %12 = arith.truncf %11 : vector<16x128xf32> to vector<16x128xbf16>
    %c0_8 = arith.constant 0 : index
    %c0_9 = arith.constant 0 : index
    %13 = vector.load %arg5[%c0_8, %c0_9] : memref<128x128xbf16, #tpu.memory_space<vmem>>, vector<128x128xbf16>
    %cst_10 = arith.constant dense<0.000000e+00> : vector<16x128xf32>
    %14 = tpu.matmul %12, %13, %cst_10 {dimension_numbers = #tpu.dot_dimension_numbers<[1], [0], [0], [1], [0, 0, 1, 1], [], []>} : vector<16x128xbf16>, vector<128x128xbf16>, vector<16x128xf32> -> vector<16x128xf32>
    %c0_11 = arith.constant 0 : index
    %c0_12 = arith.constant 0 : index
    %15 = vector.load %arg6[%c0_11, %c0_12] : memref<1x128xf32, #tpu.memory_space<vmem>>, vector<1x128xf32>
    %16 = vector.broadcast %15 : vector<1x128xf32> to vector<16x128xf32>
    %17 = arith.addf %14, %16 : vector<16x128xf32>
    %c0_13 = arith.constant 0 : index
    %c0_14 = arith.constant 0 : index
    %18 = vector.load %arg7[%c0_13, %c0_14] : memref<16x128xf32, #tpu.memory_space<vmem>>, vector<16x128xf32>
    tpu.vector_store %arg7[%c0_13, %c0_14], %17 {strides = array<i32>} : memref<16x128xf32, #tpu.memory_space<vmem>>, vector<16x128xf32>,
    return
  }
  func.func @transform_0(%arg0: i32) -> (i32, i32) {
    %c0_i32 = arith.constant 0 : i32
    %c0_i32_0 = arith.constant 0 : i32
    return %arg0, %c0_i32 : i32, i32
  }
  func.func @transform_1(%arg0: i32) -> (i32, i32) {
    %c0_i32 = arith.constant 0 : i32
    %c0_i32_0 = arith.constant 0 : i32
    %c0_i32_1 = arith.constant 0 : i32
    return %c0_i32, %c0_i32_0 : i32, i32
  }
  func.func @transform_2(%arg0: i32) -> (i32, i32) {
    %c0_i32 = arith.constant 0 : i32
    %c0_i32_0 = arith.constant 0 : i32
    %c0_i32_1 = arith.constant 0 : i32
    return %c0_i32, %c0_i32_0 : i32, i32
  }
  func.func @transform_3(%arg0: i32) -> (i32, i32) {
    %c0_i32 = arith.constant 0 : i32
    %c0_i32_0 = arith.constant 0 : i32
    %c0_i32_1 = arith.constant 0 : i32
    return %c0_i32, %c0_i32_0 : i32, i32
  }
  func.func @transform_4(%arg0: i32) -> (i32, i32) {
    %c0_i32 = arith.constant 0 : i32
    %c0_i32_0 = arith.constant 0 : i32
    %c0_i32_1 = arith.constant 0 : i32
    return %c0_i32, %c0_i32_0 : i32, i32
  }
  func.func @transform_5(%arg0: i32) -> (i32, i32) {
    %c0_i32 = arith.constant 0 : i32
    %c0_i32_0 = arith.constant 0 : i32
    %c0_i32_1 = arith.constant 0 : i32
    return %c0_i32, %c0_i32_0 : i32, i32
  }
  func.func @transform_6(%arg0: i32) -> (i32, i32) {
    %c0_i32 = arith.constant 0 : i32
    %c0_i32_0 = arith.constant 0 : i32
    return %arg0, %c0_i32 : i32, i32
  }
}

</mosaic_0001>

<bundles_post_ra>
// kernel: classblock_forward.1
= control target key start
LH: loop header
LB: loop body
LE: loop exit
PB: predicated region body
PF: predicated region fallthrough
CT: control target
= control target key end

     0   :  { %11 = vsyncpa [#allocation3], 0  ;;  %s534_s0 = inlined_call_operand.vmem [shape: f32[16,128], index: 0, kind: input, shape index: {}]   ;;  %s535_s1 = inlined_call_operand.hbm [shape: bf16[128,128], index: 1, kind: input, shape index: {}]   ;;  %s536_s2 = inlined_call_operand.vmem [shape: f32[1,128], index: 2, kind: input, shape index: {}]   ;;  %s537_s3 = inlined_call_operand.vmem [shape: f32[1,128], index: 3, kind: input, shape index: {}]   ;;  %s538_s4 = inlined_call_operand.hbm [shape: bf16[128,128], index: 4, kind: input, shape index: {}]   ;;  %s539_s5 = inlined_call_operand.vmem [shape: f32[1,128], index: 5, kind: input, shape index: {}]   ;;  %s540_s6 = inlined_call_operand.vmem [shape: f32[16,128], index: 6, kind: output, shape index: {}]  }
   0x1   :  { %12 = vsyncpa [#allocation5], 0  ;;  %s448_s21 = smov [#allocation2]   ;;  %s400_s25 = scalar_lea.hbm %s535_s1, 1024 }
   0x2   :  { %s20_s22 = sshll.u32 %s448_s21, 4  ;;  %p401_p0 = scmp.ne.s32.totalorder %s535_s1, %s400_s25  ;;  %s21_s22 = int_to_ptr.vmem [resolvable:$true] %s20_s22 }
   0x3   :  { %p404_p1 = scmp.lt.u32.totalorder %s400_s25, %s535_s1 }
   0x5   :  { %p406_p2 = pnand %p404_p1, %p401_p0 }
   0x7   :  { %409 = shalt.err (!%p406_p2)
}
   0x8   :  { %s410_s30 = scalar_lea.vmem %s21_s22, 1024  ;;  %p415_p4 = scmp.lt.s32.totalorder %s21_s22, %s21_s22 }
   0x9   :  { %p411_p3 = scmp.ne.s32.totalorder %s21_s22, %s410_s30  ;;  %p416_p5 = scmp.lt.s32.totalorder %s410_s30, %s410_s30 }
   0xb   :  { %p417_p6 = por %p416_p5, %p415_p4 }
   0xd   :  { %p418_p7 = pnand %p417_p6, %p411_p3 }
   0xf   :  { %421 = shalt.err (!%p418_p7)
}
  0x10   :  { %s449_s7 = smov 64   ;;  %s450_s8 = smov 4  }
  0x11   :  { %26 = dma.hbm_to_vmem [thread:$0]  %s535_s1, 1024, %s21_s22, [#allocation3], %s449_s7, %s449_s7, %s450_s8  }
  0x12   :  { %s451_s11 = smov [#allocation4]   ;;  %s422_s15 = scalar_lea.hbm %s538_s4, 1024 }
  0x13   :  { %s36_s12 = sshll.u32 %s451_s11, 4  ;;  %p423_p8 = scmp.ne.s32.totalorder %s538_s4, %s422_s15  ;;  %s37_s12 = int_to_ptr.vmem [resolvable:$true] %s36_s12 }
  0x14   :  { %p426_p9 = scmp.lt.u32.totalorder %s422_s15, %s538_s4 }
  0x16   :  { %p428_p10 = pnand %p426_p9, %p423_p8 }
  0x18   :  { %431 = shalt.err (!%p428_p10)
}
  0x19   :  { %s432_s20 = scalar_lea.vmem %s37_s12, 1024  ;;  %p437_p12 = scmp.lt.s32.totalorder %s37_s12, %s37_s12 }
  0x1a   :  { %p433_p11 = scmp.ne.s32.totalorder %s37_s12, %s432_s20  ;;  %p438_p13 = scmp.lt.s32.totalorder %s432_s20, %s432_s20 }
  0x1c   :  { %p439_p0 = por %p438_p13, %p437_p12 }
  0x1e   :  { %p440_p1 = pnand %p439_p0, %p433_p11 }
  0x20   :  { %443 = shalt.err (!%p440_p1)
}
  0x21   :  { %42 = dma.hbm_to_vmem [thread:$0]  %s538_s4, 1024, %s37_s12, [#allocation5], %s449_s7, %s449_s7, %s450_s8  }
  0x22   :  { %444 = dma.done.wait [#allocation3], 1024  }
  0x23   :  { %445 = vsyncadd [#allocation3], 4294966272 }
  0x24   :  { %446 = dma.done.wait [#allocation5], 1024  }
  0x25   :  { %447 = vsyncadd [#allocation5], 4294966272  ;;  %v452_v0 = vmov 0.0   ;;  %vm453_vm0 = vmmov 0   ;;  %v384_v1 = vld [vmem:[#allocation2] sm:$0xff]   ;;  %v385_v2 = vld [vmem:[#allocation2 + $0x8] sm:$0xff]  }
  0x26   :  { %338 = vmatprep.subr.bf16.mxu0 %v452_v0  ;;  %354 = vmatprep.mubr.msk.bf16.mxu0 %vm453_vm0, %v452_v0  ;;  %v386_v3 = vld [vmem:[#allocation2 + $0x10] sm:$0xff]   ;;  %v392_v4 = vld [vmem:[#allocation4] sm:$0xff]   ;;  %v387_v5 = vld [vmem:[#allocation2 + $0x18] sm:$0xff]  }
  0x27   :  { %358 = vmatprep.subr.bf16.mxu1 %v452_v0  ;;  %374 = vmatprep.mubr.msk.bf16.mxu1 %vm453_vm0, %v452_v0  ;;  %v393_v6 = vld [vmem:[#allocation4 + $0x8] sm:$0xff]   ;;  %v388_v7 = vld [vmem:[#allocation2 + $0x20] sm:$0xff]   ;;  %v394_v8 = vld [vmem:[#allocation4 + $0x10] sm:$0xff]  }
  0x28   :  { %339 = vmatpush3.bf16.msra.mxu0 %v384_v1  ;;  %359 = vmatpush3.bf16.msra.mxu1 %v392_v4  ;;  %v389_v9 = vld [vmem:[#allocation2 + $0x28] sm:$0xff]   ;;  %v395_v10 = vld [vmem:[#allocation4 + $0x18] sm:$0xff]   ;;  %v390_v11 = vld [vmem:[#allocation2 + $0x30] sm:$0xff]  }
  0x29   :  { %340 = vmatprep.subr.bf16.mxu0 %v452_v0  ;;  %360 = vmatprep.subr.bf16.mxu1 %v452_v0  ;;  %v396_v12 = vld [vmem:[#allocation4 + $0x20] sm:$0xff]   ;;  %v391_v13 = vld [vmem:[#allocation2 + $0x38] sm:$0xff]   ;;  %v53_v15 = vld [vmem:[%s534_s0 + $0x8] sm:$0xff] }
  0x2a   :  { %v52_v14 = vld [vmem:[%s534_s0] sm:$0xff]  ;;  %v397_v17 = vld [vmem:[#allocation4 + $0x28] sm:$0xff]   ;;  %v398_v18 = vld [vmem:[#allocation4 + $0x30] sm:$0xff]  }
  0x2b   :  { %v54_v16 = vpack.c.bf16 %v53_v15, %v52_v14  ;;  %v399_v19 = vld [vmem:[#allocation4 + $0x38] sm:$0xff]   ;;  %v309_v20 = vld [vmem:[%s536_s2] ss:$0 sm:$0xff] }
  0x2c   :  { %341 = vmatpush3.bf16.msra.mxu0 %v385_v2  ;;  %361 = vmatpush3.bf16.msra.mxu1 %v393_v6  ;;  %v310_v22 = vld [vmem:[%s537_s3] ss:$0 sm:$0xff] }
  0x2d   :  { %342 = vmatprep.subr.bf16.mxu0 %v452_v0  ;;  %362 = vmatprep.subr.bf16.mxu1 %v452_v0  ;;  %v311_v33 = vld [vmem:[%s539_s5] ss:$0 sm:$0xff] }
  0x30   :  { %343 = vmatpush3.bf16.msra.mxu0 %v386_v3  ;;  %363 = vmatpush3.bf16.msra.mxu1 %v394_v8 }
  0x31   :  { %344 = vmatprep.subr.bf16.mxu0 %v452_v0  ;;  %364 = vmatprep.subr.bf16.mxu1 %v452_v0 }
  0x34   :  { %345 = vmatpush3.bf16.msra.mxu0 %v387_v5  ;;  %365 = vmatpush3.bf16.msra.mxu1 %v395_v10 }
  0x35   :  { %346 = vmatprep.subr.bf16.mxu0 %v452_v0  ;;  %366 = vmatprep.subr.bf16.mxu1 %v452_v0 }
  0x38   :  { %347 = vmatpush3.bf16.msra.mxu0 %v388_v7  ;;  %367 = vmatpush3.bf16.msra.mxu1 %v396_v12 }
  0x39   :  { %348 = vmatprep.subr.bf16.mxu0 %v452_v0  ;;  %368 = vmatprep.subr.bf16.mxu1 %v452_v0 }
  0x3c   :  { %349 = vmatpush3.bf16.msra.mxu0 %v389_v9  ;;  %369 = vmatpush3.bf16.msra.mxu1 %v397_v17 }
  0x3d   :  { %350 = vmatprep.subr.bf16.mxu0 %v452_v0  ;;  %370 = vmatprep.subr.bf16.mxu1 %v452_v0 }
  0x40   :  { %351 = vmatpush3.bf16.msra.mxu0 %v390_v11  ;;  %371 = vmatpush3.bf16.msra.mxu1 %v398_v18 }
  0x41   :  { %352 = vmatprep.subr.bf16.mxu0 %v452_v0  ;;  %372 = vmatprep.subr.bf16.mxu1 %v452_v0 }
  0x44   :  { %353 = vmatpush3.bf16.msra.mxu0 %v391_v13  ;;  %373 = vmatpush3.bf16.msra.mxu1 %v399_v19 }
  0x47   :  { %355 = vmatmul.mubr.bf16.vlgmr.msra.gmra.mrb[0].mxu0 %v54_v16 }
 0x11a   :  { %v153_v21 = vpop.f32.mrb[0].mxu0 }
 0x11b   :  { %v167_v23 = vmul.f32 %v309_v20, %v153_v21  ;;  %v356_v24 = vpop.f32.mrb[1].mxu0 }
 0x11c   :  { %v156_v25 = vpop.f32.mrb[2].mxu0 }
 0x11d   :  { %v176_v26 = vadd.f32 %v310_v22, %v167_v23  ;;  %v168_v27 = vmul.f32 %v309_v20, %v156_v25  ;;  %v357_v28 = vpop.f32.mrb[3].mxu0 }
 0x11f   :  { %v177_v29 = vadd.f32 %v310_v22, %v168_v27  ;;  %v178_v30 = vmax.f32 %v176_v26, 0.0 }
 0x121   :  { %v179_v31 = vmax.f32 %v177_v29, 0.0 }
 0x123   :  { %v180_v32 = vpack.c.bf16 %v179_v31, %v178_v30 }
 0x125   :  { %375 = vmatmul.mubr.bf16.vlgmr.msra.gmra.mrb[0].mxu1 %v180_v32 }
 0x1f8   :  { %v286_v34 = vpop.f32.mrb[0].mxu1 }
 0x1f9   :  { %v287_v35 = vadd.f32 %v311_v33, %v286_v34  ;;  %v376_v36 = vpop.f32.mrb[1].mxu1 }
 0x1fa   :  { %v289_v37 = vpop.f32.mrb[2].mxu1 }
 0x1fb   :  { %293 = vst [vmem:[%s540_s6] sm:$0xff] %v287_v35  ;;  %v290_v38 = vadd.f32 %v311_v33, %v289_v37  ;;  %v377_v39 = vpop.f32.mrb[3].mxu1 }
 0x1fd   :  { %294 = vst [vmem:[%s540_s6 + $0x8] sm:$0xff] %v290_v38 }
 0x1fe   :  { %299 = vsyncpa [#allocation3], 1 }
 0x1ff   :  { %300 = vsyncpa [#allocation5], 1 }

</bundles_post_ra>
